<compile_context>
chip_gen: v5e
topology: v5e:2x2
jax: 0.10.0
libtpu: 0.0.40
codegen_flags: <defaults>
</compile_context>

<pallas_src>
import math

import jax
import jax.numpy as jnp
from jax.experimental import pallas as pl
from jax.experimental.pallas import tpu as pltpu


# ----------------------------------------------------------------------------
# Cache construction (buffer setup -- plain JAX glue, deterministic)
# ----------------------------------------------------------------------------
def _get_factor(dim, base, max_position_embeddings, beta_slow, beta_fast):
    fast_dim = dim / 2 * (
        math.log(max_position_embeddings / (2 * math.pi * beta_fast)) / math.log(base)
    )
    fast_dim = max(math.floor(fast_dim), 0)
    slow_dim = dim / 2 * (
        math.log(max_position_embeddings / (2 * math.pi * beta_slow)) / math.log(base)
    )
    slow_dim = min(math.ceil(slow_dim), dim - 1)
    if fast_dim == slow_dim:
        slow_dim += 0.001
    dim_arange = jnp.arange(0, dim // 2, dtype=jnp.float32)
    dim_factor = jnp.clip((dim_arange - fast_dim) / (slow_dim - fast_dim), 0.0, 1.0)
    return 1.0 - dim_factor


def build_cos_sin_cache(dim, max_position_embeddings, base, scaling_factor,
                        beta_slow, beta_fast, seq_len=None):
    if seq_len is None:
        seq_len = math.ceil(max_position_embeddings * scaling_factor)
    dim_arange = jnp.arange(0, dim, 2, dtype=jnp.float32) / dim
    freq = jnp.asarray(base, jnp.float32) ** dim_arange
    theta = 1.0 / freq
    interleave_theta = theta / scaling_factor
    factor = _get_factor(dim, base, max_position_embeddings, beta_slow, beta_fast)
    yarn_theta = factor * theta + (1.0 - factor) * interleave_theta

    positions = jnp.arange(seq_len, dtype=jnp.float32)
    freqs = jnp.outer(positions, yarn_theta)                 # (seq_len, dim//2)
    cos_half = jnp.cos(freqs)
    sin_half = jnp.sin(freqs)
    cos_cached = jnp.concatenate((cos_half, cos_half), axis=-1)       # (seq_len, dim)
    sin_cached = jnp.concatenate((sin_half, sin_half), axis=-1)       # (seq_len, dim)
    # Sign-folded sin so that:  rotate_half(x) * sin == roll(x, dim//2) * signed_sin
    signed_sin_cached = jnp.concatenate((-sin_half, sin_half), axis=-1)

    temperature = jnp.log(positions + 1.0) / math.log(max_position_embeddings)
    n_ones = min(max_position_embeddings, seq_len)
    temperature = temperature.at[:n_ones].set(1.0)
    temperature = temperature[:, None]                                # (seq_len, 1)

    return cos_cached, sin_cached, signed_sin_cached, temperature, seq_len


# ----------------------------------------------------------------------------
# Pallas kernels: per-(batch, seq_tile, head) RoPE application
# ----------------------------------------------------------------------------
def _rope_temp_kernel(x_ref, cos_ref, ssin_ref, temp_ref, o_ref):
    # x_ref: (1,1,T,D); cos_ref/ssin_ref: (1,T,D); temp_ref: (1,T,1)
    x = x_ref[0, 0]                     # (T, D)
    t = temp_ref[0]                     # (T, 1)
    c = cos_ref[0] * t                  # temperature-scaled cos
    s = ssin_ref[0] * t                 # temperature-scaled signed sin
    d = x.shape[-1]
    o_ref[0, 0] = x * c + pltpu.roll(x, shift=d // 2, axis=1) * s


def _rope_kernel(x_ref, cos_ref, ssin_ref, o_ref):
    x = x_ref[0, 0]
    d = x.shape[-1]
    o_ref[0, 0] = x * cos_ref[0] + pltpu.roll(x, shift=d // 2, axis=1) * ssin_ref[0]


def _pick_seq_tile(seq, dtype, target=512):
    """Largest sublane-aligned tile <= target that divides seq (else full seq)."""
    itemsize = jnp.dtype(dtype).itemsize
    sub = max(8, 32 // max(itemsize, 1))     # 8 (f32) / 16 (bf16) / 32 (int8)
    if seq <= target or seq % sub != 0:
        return seq                            # whole-sequence block (always legal)
    tile, cand = sub, sub
    while cand <= target:
        if seq % cand == 0:
            tile = cand
        cand += sub
    return tile


def _apply_rope(x, cos, ssin, temp=None, *, seq_tile_target=512):
    """x: (B,H,S,D); cos/ssin: (B,S,D); temp: (B,S,1) or None."""
    B, H, S, D = x.shape
    ts = _pick_seq_tile(S, x.dtype, seq_tile_target)
    # Head innermost: cos/ssin/temp block indices are constant across heads,
    # so Pallas skips their re-DMA (read once per (batch, seq_tile)).
    grid = (B, S // ts, H)

    x_spec = pl.BlockSpec((1, 1, ts, D), lambda b, s, h: (b, h, s, 0))
    cs_spec = pl.BlockSpec((1, ts, D), lambda b, s, h: (b, s, 0))

    in_specs = [x_spec, cs_spec, cs_spec]
    args = [x, cos, ssin]
    kernel = _rope_kernel
    if temp is not None:
        in_specs.append(pl.BlockSpec((1, ts, 1), lambda b, s, h: (b, s, 0)))
        args.append(temp)
        kernel = _rope_temp_kernel

    # NOTE: no input_output_aliases -- the module is non-destructive (returns
    # fresh q_embed/k_embed); aliasing would donate q/k to the outputs.
    return pl.pallas_call(
        kernel,
        out_shape=jax.ShapeDtypeStruct(x.shape, x.dtype),
        grid_spec=pltpu.PrefetchScalarGridSpec(
            num_scalar_prefetch=0,
            grid=grid,
            in_specs=in_specs,
            out_specs=x_spec,
        ),
        compiler_params=pltpu.CompilerParams(
            dimension_semantics=("parallel", "parallel", "parallel")),
    )(*args)


# ----------------------------------------------------------------------------
# Module-equivalent wrapper
# ----------------------------------------------------------------------------
class YarnDynamicTemperatureLogNRotaryEmbedding:
    def __init__(self, dim, max_position_embeddings=2048, base=10000,
                 scaling_factor=1.0, beta_slow=2, beta_fast=128):
        self.dim = dim
        self.base = base
        self.scaling_factor = scaling_factor
        self.beta_slow = beta_slow
        self.beta_fast = beta_fast
        self.max_position_embeddings = max_position_embeddings
        self._set_cos_sin_cache()

    def _set_cos_sin_cache(self, seq_len=None):
        (self.cos_cached, self.sin_cached, self.signed_sin_cached,
         self.temperature, self.max_seq_len_cached) = build_cos_sin_cache(
            self.dim, self.max_position_embeddings, self.base,
            self.scaling_factor, self.beta_slow, self.beta_fast, seq_len=seq_len)

    def __call__(self, q, k, position_ids):
        # Dynamic cache growth is host-side glue (position_ids is concrete here;
        # not jit/trace-safe by design, mirroring the PyTorch module).
        seq_len = max(int(jnp.max(position_ids)) + 1, k.shape[2])
        if seq_len > self.max_seq_len_cached:
            self.scaling_factor = seq_len / self.max_position_embeddings
            self._set_cos_sin_cache(seq_len=seq_len)

        dtype = k.dtype
        sq, sk = q.shape[2], k.shape[2]
        # TODO(synk): for contiguous position_ids the cos/sin gather could be
        # fused into the kernel via scalar-prefetch index_maps (direct cache
        # row DMA); kept as an XLA gather so arbitrary position_ids stay supported.
        k_cos = jnp.take(self.cos_cached, position_ids, axis=0).astype(dtype)         # (B,Sk,D)
        k_ssin = jnp.take(self.signed_sin_cached, position_ids, axis=0).astype(dtype)
        if sq == sk:
            q_pos = position_ids
            q_cos, q_ssin = k_cos, k_ssin
        else:
            q_pos = position_ids[:, -sq:]
            q_cos = jnp.take(self.cos_cached, q_pos, axis=0).astype(dtype)            # (B,Sq,D)
            q_ssin = jnp.take(self.signed_sin_cached, q_pos, axis=0).astype(dtype)
        temp = jnp.take(self.temperature, q_pos, axis=0).astype(dtype)                # (B,Sq,1)

        q_embed = _apply_rope(q, q_cos, q_ssin, temp)
        k_embed = _apply_rope(k, k_cos, k_ssin, None)
        return q_embed, k_embed


# ----------------------------------------------------------------------------
# Pure-JAX reference (mirrors the PyTorch forward) for verification
# ----------------------------------------------------------------------------
def _rotate_half(x):
    d = x.shape[-1]
    x1 = x[..., : d // 2]
    x2 = x[..., d // 2:]
    return jnp.concatenate((-x2, x1), axis=-1)


def _reference(rope, q, k, position_ids):
    dtype = k.dtype
    sq = q.shape[2]
    k_cos = jnp.take(rope.cos_cached, position_ids, axis=0).astype(dtype)[:, None]  # (B,1,Sk,D)
    k_sin = jnp.take(rope.sin_cached, position_ids, axis=0).astype(dtype)[:, None]
    q_cos = k_cos[..., -sq:, :]
    q_sin = k_sin[..., -sq:, :]
    q_pos = position_ids[:, -sq:]
    temp = jnp.take(rope.temperature, q_pos, axis=0).astype(dtype)[:, None]          # (B,1,Sq,1)
    q_cos = q_cos * temp
    q_sin = q_sin * temp
    q_embed = q * q_cos + _rotate_half(q) * q_sin
    k_embed = k * k_cos + _rotate_half(k) * k_sin
    return q_embed, k_embed


if __name__ == "__main__":
    key = jax.random.PRNGKey(0)
    B, H, S, D = 2, 4, 8, 128        # D=128 -> lane-dense loads/stores (fast path)
    max_pos = 64

    kq, kk = jax.random.split(key)
    q = jax.random.normal(kq, (B, H, S, D), dtype=jnp.float32)
    k = jax.random.normal(kk, (B, H, S, D), dtype=jnp.float32)
    # Positions beyond max_position_embeddings so the log-N temperature path
    # (temperature != 1) is exercised; still inside the yarn-scaled cache.
    position_ids = jnp.tile(jnp.arange(S, dtype=jnp.int32)[None, :] + 70, (B, 1))

    rope = YarnDynamicTemperatureLogNRotaryEmbedding(
        dim=D, max_position_embeddings=max_pos, base=10000,
        scaling_factor=2.0, beta_slow=2, beta_fast=128)

    # Prefill-style case (Sq == Sk).
    q_embed, k_embed = rope(q, k, position_ids)
    jax.block_until_ready((q_embed, k_embed))
    q_ref, k_ref = _reference(rope, q, k, position_ids)
    assert jnp.allclose(q_embed, q_ref, atol=1e-5, rtol=1e-5)
    assert jnp.allclose(k_embed, k_ref, atol=1e-5, rtol=1e-5)

    # Decode-style case (Sq < Sk): q only carries the last 4 positions.
    q_small = q[:, :, -4:, :]
    q_embed2, k_embed2 = rope(q_small, k, position_ids)
    jax.block_until_ready((q_embed2, k_embed2))
    q_ref2, k_ref2 = _reference(rope, q_small, k, position_ids)
    assert jnp.allclose(q_embed2, q_ref2, atol=1e-5, rtol=1e-5)
    assert jnp.allclose(k_embed2, k_ref2, atol=1e-5, rtol=1e-5)

    print("KERNEL_OK")
</pallas_src>

<mosaic_0001>
module attributes {stable_mosaic.version = 11 : i64} {
  func.func @_rope_temp_kernel(%arg0: i32, %arg1: i32, %arg2: i32, %arg3: memref<1x1x8x128xf32, #tpu.memory_space<vmem>>, %arg4: memref<1x8x128xf32, #tpu.memory_space<vmem>>, %arg5: memref<1x8x128xf32, #tpu.memory_space<vmem>>, %arg6: memref<1x8x1xf32, #tpu.memory_space<vmem>>, %arg7: memref<1x1x8x128xf32, #tpu.memory_space<vmem>>) attributes {dimension_semantics = [#tpu.dimension_semantics<parallel>, #tpu.dimension_semantics<parallel>, #tpu.dimension_semantics<parallel>], iteration_bounds = array<i64: 2, 1, 4>, scalar_prefetch = 0 : i64, scratch_operands = 0 : i64, tpu.core_type = #tpu.core_type<tc>, window_params = [{transform_indices = @transform_0, window_bounds = array<i64: 1, 1, 8, 128>}, {transform_indices = @transform_1, window_bounds = array<i64: 1, 8, 128>}, {transform_indices = @transform_2, window_bounds = array<i64: 1, 8, 128>}, {transform_indices = @transform_3, window_bounds = array<i64: 1, 8, 1>}, {transform_indices = @transform_4, window_bounds = array<i64: 1, 1, 8, 128>}]} {
    %c0 = arith.constant 0 : index
    %c0_0 = arith.constant 0 : index
    %c0_1 = arith.constant 0 : index
    %c0_2 = arith.constant 0 : index
    %0 = vector.load %arg3[%c0, %c0_0, %c0_1, %c0_2] : memref<1x1x8x128xf32, #tpu.memory_space<vmem>>, vector<1x1x8x128xf32>
    %1 = vector.shape_cast %0 : vector<1x1x8x128xf32> to vector<8x128xf32>
    %c0_3 = arith.constant 0 : index
    %c0_4 = arith.constant 0 : index
    %c0_5 = arith.constant 0 : index
    %2 = vector.load %arg6[%c0_3, %c0_4, %c0_5] : memref<1x8x1xf32, #tpu.memory_space<vmem>>, vector<1x8x1xf32>
    %3 = vector.shape_cast %2 : vector<1x8x1xf32> to vector<8x1xf32>
    %c0_6 = arith.constant 0 : index
    %c0_7 = arith.constant 0 : index
    %c0_8 = arith.constant 0 : index
    %4 = vector.load %arg4[%c0_6, %c0_7, %c0_8] : memref<1x8x128xf32, #tpu.memory_space<vmem>>, vector<1x8x128xf32>
    %5 = vector.shape_cast %4 : vector<1x8x128xf32> to vector<8x128xf32>
    %6 = vector.broadcast %3 : vector<8x1xf32> to vector<8x128xf32>
    %7 = arith.mulf %5, %6 : vector<8x128xf32>
    %c0_9 = arith.constant 0 : index
    %c0_10 = arith.constant 0 : index
    %c0_11 = arith.constant 0 : index
    %8 = vector.load %arg5[%c0_9, %c0_10, %c0_11] : memref<1x8x128xf32, #tpu.memory_space<vmem>>, vector<1x8x128xf32>
    %9 = vector.shape_cast %8 : vector<1x8x128xf32> to vector<8x128xf32>
    %10 = vector.broadcast %3 : vector<8x1xf32> to vector<8x128xf32>
    %11 = arith.mulf %9, %10 : vector<8x128xf32>
    %12 = arith.mulf %1, %7 : vector<8x128xf32>
    %c64_i32 = arith.constant 64 : i32
    %13 = tpu.dynamic_rotate %1 by %c64_i32 dim 1 : vector<8x128xf32>, i32 -> vector<8x128xf32>
    %14 = arith.mulf %13, %11 : vector<8x128xf32>
    %15 = arith.addf %12, %14 : vector<8x128xf32>
    %c0_12 = arith.constant 0 : index
    %c0_13 = arith.constant 0 : index
    %c0_14 = arith.constant 0 : index
    %c0_15 = arith.constant 0 : index
    %16 = vector.load %arg7[%c0_12, %c0_13, %c0_14, %c0_15] : memref<1x1x8x128xf32, #tpu.memory_space<vmem>>, vector<1x1x8x128xf32>
    %17 = vector.shape_cast %16 : vector<1x1x8x128xf32> to vector<8x128xf32>
    %18 = vector.shape_cast %15 : vector<8x128xf32> to vector<1x1x8x128xf32>
    tpu.vector_store %arg7[%c0_12, %c0_13, %c0_14, %c0_15], %18 {strides = array<i32>} : memref<1x1x8x128xf32, #tpu.memory_space<vmem>>, vector<1x1x8x128xf32>,
    return
  }
  func.func @transform_0(%arg0: i32, %arg1: i32, %arg2: i32) -> (i32, i32, i32, i32) {
    %c0_i32 = arith.constant 0 : i32
    %c0_i32_0 = arith.constant 0 : i32
    return %arg0, %arg2, %arg1, %c0_i32 : i32, i32, i32, i32
  }
  func.func @transform_1(%arg0: i32, %arg1: i32, %arg2: i32) -> (i32, i32, i32) {
    %c0_i32 = arith.constant 0 : i32
    %c0_i32_0 = arith.constant 0 : i32
    return %arg0, %arg1, %c0_i32 : i32, i32, i32
  }
  func.func @transform_2(%arg0: i32, %arg1: i32, %arg2: i32) -> (i32, i32, i32) {
    %c0_i32 = arith.constant 0 : i32
    %c0_i32_0 = arith.constant 0 : i32
    return %arg0, %arg1, %c0_i32 : i32, i32, i32
  }
  func.func @transform_3(%arg0: i32, %arg1: i32, %arg2: i32) -> (i32, i32, i32) {
    %c0_i32 = arith.constant 0 : i32
    %c0_i32_0 = arith.constant 0 : i32
    return %arg0, %arg1, %c0_i32 : i32, i32, i32
  }
  func.func @transform_4(%arg0: i32, %arg1: i32, %arg2: i32) -> (i32, i32, i32, i32) {
    %c0_i32 = arith.constant 0 : i32
    %c0_i32_0 = arith.constant 0 : i32
    return %arg0, %arg2, %arg1, %c0_i32 : i32, i32, i32, i32
  }
}

</mosaic_0001>

<bundles_post_ra>
// kernel: tpu_custom_call.1
= control target key start
LH: loop header
LB: loop body
LE: loop exit
PB: predicated region body
PF: predicated region fallthrough
CT: control target
= control target key end

     0   :  { %9 = vsyncpa [#allocation3], 0  ;;  %s1091_s0 = inlined_call_operand.hbm [shape: f32[2,4,8,128], index: 0, kind: input, shape index: {}]   ;;  %s1092_s1 = inlined_call_operand.vmem [shape: f32[2,8,128], index: 1, kind: input, shape index: {}]   ;;  %s1093_s2 = inlined_call_operand.hbm [shape: f32[2,8,128], index: 2, kind: input, shape index: {}]   ;;  %s1094_s3 = inlined_call_operand.vmem [shape: f32[2,8,1], index: 3, kind: input, shape index: {}]   ;;  %s1095_s4 = inlined_call_operand.hbm [shape: f32[2,4,8,128], index: 4, kind: output, shape index: {}]  }
   0x1   :  { %11 = vsyncpa [#allocation3 + $0x1], 0 }
   0x2   :  { %12 = vsyncpa [#allocation6], 0 }
   0x3   :  { %14 = vsyncpa [#allocation6 + $0x1], 0 }
   0x4   :  { %15 = vsyncpa [#allocation4], 0 }
   0x5   :  { %17 = vsyncpa [#allocation4 + $0x1], 0  ;;  %s868_s15 = smov 0   ;;  %s870_s16 = smov 0  }
   0x6   :  { %s872_s17 = smov 0   ;;  %s874_s18 = smov 0  }
   0x7   :  { %s876_s19 = smov 0   ;;  %s878_s20 = smov 0  }
   0x8   :  { %s880_s21 = smov 0   ;;  %s882_s22 = smov 0  }
   0x9   :  { %s884_s23 = smov 0   ;;  %s886_s24 = smov 0  }
   0xa   :  { %s888_s25 = smov 0  }
   0xb LB: > { %1100 = sst [smem:[#allocation11_spill]] %s811_s18  ;;  %s523_s26 = sadd.s32 4294967295, %s839_s25   ;;  %s839_s25 = sphi %s888_s25, %s23_s25   ;;  %s835_s24 = sphi %s886_s24, %s1126_s24   ;;  %s831_s23 = sphi %s884_s23, %s1125_s23   ;;  %s827_s22 = sphi %s882_s22, %s1124_s22   ;;  %s823_s21 = sphi %s880_s21, %s1123_s21   ;;  %s819_s20 = sphi %s878_s20, %s1122_s20   ;;  %s815_s19 = sphi %s876_s19, %s1121_s19   ;;  %s811_s18 = sphi %s874_s18, %s1120_s18   ;;  %s807_s17 = sphi %s872_s17, %s1119_s17   ;;  %s803_s16 = sphi %s870_s16, %s1118_s16   ;;  %s799_s15 = sphi %s868_s15, %s1117_s15  }
   0xc   : > { %s524_s27 = sadd.s32 4294967294, %s839_s25   ;;  %s35_s28 = sadd.s32 1, %s831_s23 }
   0xd   : > { %s42_s29 = sadd.s32 1, %s835_s24  ;;  %p36_p0 = scmp.ge.s32.totalorder %s35_s28, 4 }
   0xe   : > { %s53_s30 = sadd.s32 1, %s819_s20  ;;  %p60_p1 = scmp.ne.s32.totalorder %s819_s20, %s815_s19 }
   0xf   : > { %p61_p2 = scmp.eq.s32.totalorder %s839_s25, 0  ;;  %s1128_s28 = smov (%p36_p0, %s35_s28), 0 }
  0x10   : > { %1101 = sst [smem:[#allocation12_spill]] %s1128_s28  ;;  %s1130_s29 = smov (!%p36_p0, %s42_s29), %s835_s24 }
  0x11   : > { %s47_s5 = ssub.s32 %s831_s23, %s1128_s28  ;;  %p938_p3 = por %p61_p2, %p60_p1 }
  0x12   : > { %p44_p4 = scmp.ge.s32.totalorder %s1130_s29, 2  ;;  %p66_p5 = scmp.ne.s32.totalorder %s815_s19, %s811_s18 }
  0x13   : > { %p944_p6 = scmp.eq.s32.totalorder %s523_s26, 0  ;;  %p178_p7 = scmp.eq.s32.totalorder %s523_s26, 7 }
  0x14   : > { %s1132_s29 = smov (%p44_p4, %s1130_s29), 0  ;;  %p184_p10 = scmp.eq.s32.totalorder %s524_s27, 7 }
  0x15   : > { %1104 = sst [smem:[#allocation13_spill]] %s1132_s29  ;;  %p952_p8 = por %p944_p6, %p66_p5 }
  0x16   : > { %p956_p9 = por %p178_p7, %p60_p1  ;;  %s46_s10 = ssub.s32 %s835_s24, %s1132_s29 }
  0x17   : > { %s48_s11 = sor.u32 %s47_s5, %s46_s10  ;;  %p107_p11 = scmp.eq.s32.totalorder %s46_s10, 0 }
  0x18   : > { %p51_p12 = scmp.eq.s32.totalorder %s48_s11, 0  ;;  %p962_p13 = por %p184_p10, %p66_p5 }
  0x19   : > { %p560_p0 = scmp.lt.s32.totalorder %s839_s25, 8  ;;  %s204_s14 = sand.u32 1, %s819_s20  }
  0x1a   : > { %s1107_s12 = scalar_select %p962_p13, 1, 0 }
  0x1b   : > { %s968_s13 = scalar_select %p51_p12, %s819_s20, %s53_s30  }
  0x1c   : > { %1108 = sst [smem:[#allocation14_spill]] %s1107_s12  ;;  %s528_s26 = sshll.u32 %s835_s24, 2 }
  0x1d   : > { %1109 = sst [smem:[#allocation15_spill]] %s968_s13  ;;  %s527_s28 = sshll.u32 %s204_s14, 3 }
  0x1e   : > { %s213_s27 = sadd.s32 %s831_s23, %s528_s26  ;;  %s208_s11 = scalar_lea.vmem [#allocation2], %s527_s28 }
  0x1f   : > { %s529_s5 = sshll.u32 %s213_s27, 3  ;;  %s219_s29 = sshll.u32 %s208_s11, 4  ;;  %s220_s29 = int_to_ptr.vmem [resolvable:$true] %s219_s29 }
  0x20   : > { %s215_s30 = scalar_lea.hbm %s1091_s0, %s529_s5  ;;  %p550_p1 = pnand %p560_p0, %p938_p3 }
  0x21   : > { %s217_s13 = sshll.u32 %s215_s30, 4  ;;  %p532_p4 = scmp.ge.s32.totalorder %s839_s25, 1  ;;  %s218_s13 = int_to_ptr.hbm [resolvable:$true] %s217_s13 }
  0x22   : > { %p264_p5 = scmp.lt.s32.totalorder %s839_s25, 9  ;;  %s205_s26 = scalar_lea.sflag [#allocation3], %s204_s14 }
  0x23   : > { %552 = dma.hbm_to_vmem [thread:$0]  (!%p550_p1), %s218_s13, 128, %s220_s29, %s205_s26  }
  0x24   : > { %p982_p7 = pnand %p532_p4, %p264_p5  ;;  %s109_s18 = sadd.s32 1, %s807_s17 }
  0x25   : > { %s989_s12 = scalar_select %p107_p11, %s807_s17, %s109_s18  }
  0x26   : > { %p116_p10 = scmp.ne.s32.totalorder %s807_s17, %s803_s16  ;;  %p122_p12 = scmp.ne.s32.totalorder %s803_s16, %s799_s15 }
  0x27   : > { %s236_s27 = sand.u32 1, %s807_s17   ;;  %s531_s6 = sshll.u32 %s835_s24, 3 }
  0x28   : > { %p999_p3 = por %p122_p12, %p944_p6  ;;  %p118_p1 = por %p116_p10, %p61_p2 }
  0x29   : > { %s530_s29 = sshll.u32 %s236_s27, 3  ;;  %s245_s11 = scalar_lea.hbm %s1093_s2, %s531_s6 }
  0x2a   : > { %s247_s30 = sshll.u32 %s245_s11, 4  ;;  %s240_s10 = scalar_lea.vmem [#allocation5], %s530_s29  ;;  %s248_s30 = int_to_ptr.hbm [resolvable:$true] %s247_s30 }
  0x2b   : > { %s249_s26 = sshll.u32 %s240_s10, 4  ;;  %p553_p11 = pnand %p560_p0, %p118_p1  ;;  %s250_s26 = int_to_ptr.vmem [resolvable:$true] %s249_s26 }
  0x2c   : > { %s237_s15 = scalar_lea.sflag [#allocation6], %s236_s27  ;;  %268 = sbr.rel (%p982_p7) target bundleno = 191 (0xbf), region = 36 }
  0x2d   : > { %555 = dma.hbm_to_vmem [thread:$0]  (!%p553_p11), %s248_s30, 128, %s250_s26, %s237_s15  }
  0x2e   : > { %s1013_s7 = sand.u32 (!%p982_p7), 1, %s815_s19  }
  0x2f   : > { %s533_s18 = sshll.u32 (!%p982_p7), %s1013_s7, 3  ;;  %s271_s6 = scalar_lea.sflag (!%p982_p7), [#allocation3], %s1013_s7 }
  0x30   : > { %s274_s29 = scalar_lea.vmem (!%p982_p7), [#allocation2], %s533_s18 }
  0x31   : > { %786 = dma.done.wait (%p952_p8), %s271_s6, 128  }
  0x32   : > { %788 = vsyncadd (%p952_p8), %s271_s6, 4294967168  ;;  %s280_s28 = sand.u32 1, %s803_s16  }
  0x33   : > { %s534_s27 = sshll.u32 %s280_s28, 3  ;;  %s281_s13 = scalar_lea.sflag [#allocation6], %s280_s28 }
  0x34   : > { %s284_s14 = scalar_lea.vmem [#allocation5], %s534_s27 }
  0x35   : > { %790 = dma.done.wait (%p999_p3), %s281_s13, 128  }
  0x36   : > { %792 = vsyncadd (%p999_p3), %s281_s13, 4294967168  ;;  %p329_p2 = scmp.lt.s32.totalorder %s827_s22, 1  ;;  %v841_v0 = vmov 0   ;;  %v343_v2 = vld [vmem:[%s274_s29] sm:$0xff]  ;;  %s842_s15 = smov 64   ;;  %v352_v5 = vld [vmem:[%s284_s14] sm:$0xff] }
  0x37   : > { %652 = vset.pattern.permute.xlu0 %v841_v0  ;;  %s539_s5 = sshll.u32 %s827_s22, 2 }
  0x38   : > { %s330_s8 = scalar_select %p329_p2, %s827_s22, 1 }
  0x39   : > { %s372_s13 = sadd.s32 %s823_s21, %s539_s5  ;;  %s328_s22 = scalar_lea.vmem [#allocation7], %s533_s18 }
  0x3a   : > { %s536_s11 = sshll.u32 %s330_s8, 3  ;;  %s540_s8 = sshll.u32 %s372_s13, 3 }
  0x3b   : > { %s342_s26 = scalar_lea.vmem %s1094_s3, %s536_s11  ;;  %s335_s27 = scalar_lea.vmem %s1092_s1, %s536_s11 }
  0x3c   : > { %v344_v1 = vld [vmem:[%s342_s26] sm:$0xff]  ;;  %s374_s26 = scalar_lea.hbm %s1095_s4, %s540_s8  ;;  %s376_s29 = sshll.u32 %s328_s22, 4  ;;  %s377_s29 = int_to_ptr.vmem [resolvable:$true] %s376_s29 }
  0x3d   : > { %348 = vperm.xlu0 %652, %v344_v1   ;;  %v345_v4 = vld [vmem:[%s335_s27] sm:$0xff]  ;;  %s361_s21 = scalar_lea.sflag [#allocation4], %s1013_s7  ;;  %s733_s18 = scalar_lea.hbm %s1095_s4, 64 }
  0x45   : > { %355 = vrot.lane.b32.xlu0 %v343_v2, %s842_s15  ;;  %s378_s15 = sshll.u32 %s374_s26, 4  ;;  %s379_s15 = int_to_ptr.hbm [resolvable:$true] %s378_s15 }
  0x46   : > { %s727_s14 = sshra.s32 %s379_s15, 4  ;;  %s728_s14 = int_to_ptr.hbm [resolvable:$true] %s727_s14 }
  0x47   : > { %s729_s11 = scalar_lea.hbm %s728_s14, 8  ;;  %p734_p4 = scmp.lt.s32.totalorder %s728_s14, %s1095_s4 }
  0x48   : > { %p730_p6 = scmp.ne.s32.totalorder %s728_s14, %s729_s11  ;;  %p735_p5 = scmp.lt.s32.totalorder %s733_s18, %s729_s11 }
  0x4a   : > { %p731_p8 = pnand %p730_p6, %p956_p9  ;;  %p736_p7 = por %p735_p5, %p734_p4 }
  0x4c   : > { %p732_p0 = pneg %p731_p8 }
  0x4e   : > { %p737_p10 = pnand %p736_p7, %p732_p0 }
  0xaf   : > { %v349_v3 = vpop.permute.xlu0 %348 }
  0xb0   : > { %v351_v6 = vmul.f32 %v349_v3, %v345_v4  ;;  %v353_v7 = vmul.f32 %v352_v5, %v349_v3 }
  0xb2   : > { %v354_v9 = vmul.f32 %v351_v6, %v343_v2 }
  0xb7   : > { %v356_v8 = vpop.permute.xlu0 %355 }
  0xb8   : > { %v357_v10 = vmul.f32 %v356_v8, %v353_v7 }
  0xba   : > { %v358_v11 = vadd.f32 %v357_v10, %v354_v9 }
  0xbc   : > { %359 = vst [vmem:[%s328_s22] sm:$0xff] %v358_v11 }
  0xbd   : > { %740 = shalt.err (!%p737_p10)
}
  0xbe   : > { %547 = dma.vmem_to_hbm [thread:$0]  (%p956_p9), %s377_s29, 128, %s379_s15, %s361_s21  }
  0xbf PF: > { %s1112_s7 = sld [smem:[#allocation11_spill]]  ;;  %p561_p12 = scmp.ge.s32.totalorder %s839_s25, 2 }
  0xc1   : > { %p557_p3 = pnand %p561_p12, %p962_p13 }
  0xc3   : > { %p558_p1 = pneg %p557_p3 }
  0xc5   : > { %s390_s8 = sand.u32 1, %s1112_s7  }
  0xc6   : > { %s391_s30 = scalar_lea.sflag [#allocation4], %s390_s8 }
  0xc7   : > { %794 = dma.done.wait (%p558_p1), %s391_s30, 128  }
  0xc8   : > { %796 = vsyncadd (%p558_p1), %s391_s30, 4294967168  ;;  %s23_s25 = sadd.s32 1, %s839_s25   ;;  %s1114_s9 = sld [smem:[#allocation15_spill]] }
  0xc9   : > { %p20_p11 = scmp.ge.s32.totalorder %s23_s25, 10   ;;  %s1115_s10 = sld [smem:[#allocation12_spill]] }
  0xca   : > { %s1116_s26 = sld [smem:[#allocation13_spill]]  ;;  %s1117_s15 = smov %s803_s16 }
  0xcb   : > { %s1118_s16 = smov %s807_s17  ;;  %s1119_s17 = smov %s989_s12 }
  0xcc   : > { %s1120_s18 = smov %s815_s19  ;;  %s1121_s19 = smov %s819_s20 }
  0xcd   : > { %s1123_s21 = smov %s831_s23  ;;  %s1124_s22 = smov %s835_s24 }
  0xce   : > { %s1122_s20 = smov %s1114_s9  ;;  %22 = sbr.rel (!%p20_p11) target bundleno = 11 (0xb), region = 100 }
  0xcf   : > { %s1125_s23 = smov %s1115_s10 }
  0xd0   : > { %s1126_s24 = smov %s1116_s26 }
  0xd3   :  { %397 = vsyncpa [#allocation3], 1 }
  0xd4   :  { %399 = vsyncpa [#allocation3 + $0x1], 1 }
  0xd5   :  { %400 = vsyncpa [#allocation6], 1 }
  0xd6   :  { %402 = vsyncpa [#allocation6 + $0x1], 1 }
  0xd7   :  { %403 = vsyncpa [#allocation4], 1 }
  0xd8   :  { %405 = vsyncpa [#allocation4 + $0x1], 1 }

</bundles_post_ra>
